<compile_context>
chip_gen: v7x
topology: tpu7x:2x2x1
jax: 0.10.0
libtpu: 0.0.40
codegen_flags: <defaults>
</compile_context>

<pallas_src>
import jax
import jax.numpy as jnp
from jax.experimental import pallas as pl
from jax.experimental.pallas import tpu as pltpu

_LANE = 1024                            # wide lane-dense slab (multiple of 128)
_TARGET_BLOCK_BYTES = 8 * 1024 * 1024   # ~8 MiB per block buffer
_VMEM_LIMIT_BYTES = 40 << 20            # 4 x 8 MiB pipelined + headroom; < v7x 64 MiB


def _hardsigmoid_kernel(x_ref, o_ref):
    x = x_ref[...]
    # Compute natively for f32/bf16 (bf16-native VALUs on v6e/v7x); upcast
    # anything else (e.g. f16) to f32.  Python scalars are weak-typed so the
    # arithmetic stays in the chosen dtype.
    if x.dtype == jnp.float32 or x.dtype == jnp.bfloat16:
        xc = x
    else:
        xc = x.astype(jnp.float32)
    # relu6(x + 3) / 6  ==  clamp(x + 3, 0, 6) * (1/6)
    y = jnp.clip(xc + 3.0, 0.0, 6.0) * (1.0 / 6.0)
    o_ref[...] = y.astype(o_ref.dtype)


def _sublane_min(dtype):
    # Minimum second-to-last tile dim: 8 for 4-byte, 16 for 2-byte dtypes.
    itemsize = jnp.dtype(dtype).itemsize
    return 8 * max(1, 4 // itemsize)


def _run_2d(x2d, donate_input=False):
    """Run the elementwise kernel over a 2D (rows, lane) slab."""
    rows, lane = x2d.shape
    dtype = x2d.dtype
    itemsize = jnp.dtype(dtype).itemsize
    smin = _sublane_min(dtype)

    # ~8 MiB blocks, rows rounded down to a dtype-correct sublane multiple.
    block_rows = max(smin, (_TARGET_BLOCK_BYTES // (lane * itemsize)) // smin * smin)
    if rows <= block_rows:
        if rows >= 2 * smin:
            # Split into >= 2 blocks so both v7x TensorCores get work.
            # (Trailing partial block is fine: OOB reads are padded, OOB
            #  writes are dropped — harmless for a pure elementwise op.)
            block_rows = pl.cdiv(pl.cdiv(rows, 2), smin) * smin
        else:
            # Full-extent single block is always a legal block shape,
            # even if rows % smin != 0.
            block_rows = rows

    grid = (pl.cdiv(rows, block_rows),)

    n_elems = rows * lane
    cost = pl.CostEstimate(
        flops=3 * n_elems,                       # add + clamp + mul
        transcendentals=0,
        bytes_accessed=2 * n_elems * itemsize,   # one read + one write pass
    )

    return pl.pallas_call(
        _hardsigmoid_kernel,
        out_shape=jax.ShapeDtypeStruct((rows, lane), dtype),
        grid_spec=pltpu.PrefetchScalarGridSpec(
            num_scalar_prefetch=0,
            grid=grid,
            in_specs=[pl.BlockSpec((block_rows, lane), lambda i: (i, 0))],
            out_specs=pl.BlockSpec((block_rows, lane), lambda i: (i, 0)),
        ),
        compiler_params=pltpu.CompilerParams(
            dimension_semantics=("parallel",),
            vmem_limit_bytes=_VMEM_LIMIT_BYTES,
        ),
        cost_estimate=cost,
        input_output_aliases=({0: 0} if donate_input else {}),
    )(x2d)


def _hardsigmoid_jnp(x):
    # Tiny-tail / tiny-tensor fallback (kept off the HBM-roofline path).
    return (jnp.clip(x.astype(jnp.float32) + 3.0, 0.0, 6.0) * (1.0 / 6.0)).astype(x.dtype)


def hard_sigmoid(x, donate_input=False):
    """Applies hardsigmoid elementwise. Accepts any shape; returns same shape/dtype."""
    if not jnp.issubdtype(x.dtype, jnp.floating):
        # PyTorch HardSigmoid is float-only; integer math would truncate 0..1 to {0,1}.
        raise TypeError(f"hard_sigmoid expects a floating dtype, got {x.dtype}")
    if jnp.dtype(x.dtype).itemsize > 4:
        raise TypeError(f"64-bit dtypes are not supported on TPU: {x.dtype}")

    orig_shape = x.shape
    n = x.size
    if n == 0:
        return x

    if n % _LANE == 0:
        # Fast path: free reshape into a wide lane-dense slab, no padding copy.
        rows = n // _LANE
        out2d = _run_2d(x.reshape(rows, _LANE), donate_input=donate_input)
        return out2d.reshape(orig_shape)

    if n < _LANE:
        # Tiny tensor: not worth a kernel launch.
        return _hardsigmoid_jnp(x)

    # Ragged fallback (uncommon): kernel over the multiple-of-1024 prefix,
    # plain jnp over the (<1024-element) tail.  Avoids the pad + full-slice
    # round trip that would add extra full HBM passes.
    rows = n // _LANE
    main_n = rows * _LANE
    x_flat = jnp.ravel(x)
    main_out = _run_2d(x_flat[:main_n].reshape(rows, _LANE)).reshape(-1)
    tail_out = _hardsigmoid_jnp(x_flat[main_n:])
    return jnp.concatenate([main_out, tail_out]).reshape(orig_shape)


def hard_sigmoid_ref(x):
    return jnp.clip(x + 3.0, 0.0, 6.0) / 6.0


if __name__ == "__main__":
    key = jax.random.PRNGKey(0)

    # Primary test: NCHW input, small shape consistent with conv-style usage.
    x = jax.random.normal(key, (2, 4, 16, 16), dtype=jnp.float32) * 4.0
    out = jax.block_until_ready(hard_sigmoid(x))
    ref = hard_sigmoid_ref(x)
    assert out.shape == x.shape
    assert out.dtype == x.dtype
    assert jnp.allclose(out, ref, atol=1e-6), "mismatch vs reference (fast path)"

    # Ragged-size path (prefix kernel + jnp tail).
    key2 = jax.random.PRNGKey(1)
    xr = jax.random.normal(key2, (2, 3, 700), dtype=jnp.float32) * 4.0
    out_r = jax.block_until_ready(hard_sigmoid(xr))
    ref_r = hard_sigmoid_ref(xr)
    assert out_r.shape == xr.shape
    assert out_r.dtype == xr.dtype
    assert jnp.allclose(out_r, ref_r, atol=1e-6), "mismatch vs reference (ragged path)"

    print("KERNEL_OK")
</pallas_src>

<mosaic_0001>
module attributes {stable_mosaic.version = 11 : i64} {
  func.func @_hardsigmoid_kernel(%arg0: i32, %arg1: memref<2x1024xf32, #tpu.memory_space<vmem>>, %arg2: memref<2x1024xf32, #tpu.memory_space<vmem>>) attributes {dimension_semantics = [#tpu.dimension_semantics<parallel>], iteration_bounds = array<i64: 1>, scalar_prefetch = 0 : i64, scratch_operands = 0 : i64, tpu.core_type = #tpu.core_type<tc>, window_params = [{transform_indices = @transform_0, window_bounds = array<i64: 2, 1024>}, {transform_indices = @transform_1, window_bounds = array<i64: 2, 1024>}]} {
    %c0 = arith.constant 0 : index
    %c0_0 = arith.constant 0 : index
    %0 = vector.load %arg1[%c0, %c0_0] : memref<2x1024xf32, #tpu.memory_space<vmem>>, vector<2x1024xf32>
    %cst = arith.constant 3.000000e+00 : f32
    %1 = vector.broadcast %cst : f32 to vector<2x1024xf32>
    %2 = arith.addf %0, %1 : vector<2x1024xf32>
    %cst_1 = arith.constant 0.000000e+00 : f32
    %cst_2 = arith.constant 6.000000e+00 : f32
    %3 = vector.broadcast %cst_1 : f32 to vector<2x1024xf32>
    %4 = arith.maximumf %3, %2 : vector<2x1024xf32>
    %5 = vector.broadcast %cst_2 : f32 to vector<2x1024xf32>
    %6 = arith.minimumf %5, %4 : vector<2x1024xf32>
    %cst_3 = arith.constant 0.166666672 : f32
    %7 = vector.broadcast %cst_3 : f32 to vector<2x1024xf32>
    %8 = arith.mulf %6, %7 : vector<2x1024xf32>
    %c0_4 = arith.constant 0 : index
    %c0_5 = arith.constant 0 : index
    %9 = vector.load %arg2[%c0_4, %c0_5] : memref<2x1024xf32, #tpu.memory_space<vmem>>, vector<2x1024xf32>
    tpu.vector_store %arg2[%c0_4, %c0_5], %8 {strides = array<i32>} : memref<2x1024xf32, #tpu.memory_space<vmem>>, vector<2x1024xf32>,
    return
  }
  func.func @transform_0(%arg0: i32) -> (i32, i32) {
    %c0_i32 = arith.constant 0 : i32
    %c0_i32_0 = arith.constant 0 : i32
    return %arg0, %c0_i32 : i32, i32
  }
  func.func @transform_1(%arg0: i32) -> (i32, i32) {
    %c0_i32 = arith.constant 0 : i32
    %c0_i32_0 = arith.constant 0 : i32
    return %arg0, %c0_i32 : i32, i32
  }
}

</mosaic_0001>

<bundles_post_ra>
// kernel: tpu_custom_call.1
= control target key start
LH: loop header
LB: loop body
LE: loop exit
PB: predicated region body
PF: predicated region fallthrough
CT: control target
= control target key end

     0   :  { %6 = vsyncpa [#allocation3], 0  ;;  %s134_s0 = inlined_call_operand.hbm [shape: f32[2,1024], index: 0, kind: input, shape index: {}]   ;;  %s135_s1 = inlined_call_operand.hbm [shape: f32[2,1024], index: 1, kind: output, shape index: {}]  }
   0x1   :  { %7 = vsyncpa [#allocation4], 0  ;;  %s98_s6 = smov [#allocation2]   ;;  %s50_s10 = scalar_lea.hbm %s134_s0, 256 }
   0x2   :  { %s14_s7 = sshll.u32 %s98_s6, 4  ;;  %p51_p0 = scmp.ne.s32.totalorder %s134_s0, %s50_s10  ;;  %s15_s7 = int_to_ptr.vmem [resolvable:$true] %s14_s7 }
   0x3   :  { %p54_p1 = scmp.lt.u32.totalorder %s50_s10, %s134_s0 }
   0x5   :  { %p56_p2 = pnand %p54_p1, %p51_p0 }
   0x7   :  { %59 = shalt.err (!%p56_p2)
}
   0x8   :  { %s60_s15 = scalar_lea.vmem %s15_s7, 256  ;;  %p65_p4 = scmp.lt.s32.totalorder %s15_s7, %s15_s7 }
   0x9   :  { %p61_p3 = scmp.ne.s32.totalorder %s15_s7, %s60_s15  ;;  %p66_p5 = scmp.lt.s32.totalorder %s60_s15, %s60_s15 }
   0xb   :  { %p67_p6 = por %p66_p5, %p65_p4 }
   0xd   :  { %p68_p7 = pnand %p67_p6, %p61_p3 }
   0xf   :  { %71 = shalt.err (!%p68_p7)
}
  0x10   :  { %17 = dma.hbm_to_vmem [thread:$0]  %s134_s0, 256, %s15_s7, [#allocation3]  }
  0x11   :  { %94 = dma.done.wait [#allocation3], 256  }
  0x12   :  { %95 = vsyncadd [#allocation3], 4294967040  ;;  %v21_v0 = vld [vmem:[#allocation2] sm:$0xff]  ;;  %v22_v1 = vld [vmem:[#allocation2 + $0x8] sm:$0xff]  ;;  %s99_s18 = smov [#allocation5]  }
  0x13   :  { %v23_v2 = vadd.f32 3.0, %v21_v0  ;;  %v24_v3 = vadd.f32 3.0, %v22_v1  ;;  %s39_s19 = sshll.u32 %s99_s18, 4  ;;  %s40_s19 = int_to_ptr.vmem [resolvable:$true] %s39_s19 }
  0x14   :  { %s72_s20 = scalar_lea.vmem %s40_s19, 256  ;;  %p77_p9 = scmp.lt.s32.totalorder %s40_s19, %s40_s19 }
  0x15   :  { %v25_v4 = vmax.f32 %v23_v2, 0.0  ;;  %v26_v5 = vmax.f32 %v24_v3, 0.0  ;;  %p73_p8 = scmp.ne.s32.totalorder %s40_s19, %s72_s20  ;;  %p78_p10 = scmp.lt.s32.totalorder %s72_s20, %s72_s20 }
  0x17   :  { %v27_v6 = vmin.f32 %v25_v4, 6.0  ;;  %v28_v7 = vmin.f32 %v26_v5, 6.0  ;;  %p79_p11 = por %p78_p10, %p77_p9 }
  0x19   :  { %v29_v8 = vmul.f32 0.16666667, %v27_v6  ;;  %v30_v9 = vmul.f32 0.16666667, %v28_v7  ;;  %p80_p12 = pnand %p79_p11, %p73_p8 }
  0x1b   :  { %31 = vst [vmem:[#allocation5] sm:$0xff] %v29_v8  ;;  %32 = vst [vmem:[#allocation5 + $0x8] sm:$0xff] %v30_v9 }
  0x1c   :  { %83 = shalt.err (!%p80_p12)
}
  0x1d   :  { %s84_s22 = scalar_lea.hbm %s135_s1, 256 }
  0x1e   :  { %p85_p13 = scmp.ne.s32.totalorder %s135_s1, %s84_s22  ;;  %p88_p0 = scmp.lt.u32.totalorder %s84_s22, %s135_s1 }
  0x20   :  { %p90_p1 = pnand %p88_p0, %p85_p13 }
  0x22   :  { %93 = shalt.err (!%p90_p1)
}
  0x23   :  { %42 = dma.vmem_to_hbm [thread:$0]  %s40_s19, 256, %s135_s1, [#allocation4]  }
  0x24   :  { %96 = dma.done.wait [#allocation4], 256  }
  0x25   :  { %97 = vsyncadd [#allocation4], 4294967040 }
  0x26   :  { %46 = vsyncpa [#allocation3], 1 }
  0x27   :  { %47 = vsyncpa [#allocation4], 1 }

</bundles_post_ra>
